<compile_context>
chip_gen: v5e
topology: v5e:2x2
jax: 0.10.0
libtpu: 0.0.40
codegen_flags: <defaults>
</compile_context>

<pallas_src>
import functools

import jax
import jax.numpy as jnp
from jax.experimental import pallas as pl
from jax.experimental.pallas import tpu as pltpu

_BN_EPS = 1e-5
_INV_SQRT2 = 0.7071067811865476


def _round_up(x, m):
    return (x + m - 1) // m * m


def _vmem_budget():
    """Scoped-VMEM budget with headroom: ~45% of physical VMEM, capped at 48 MiB."""
    try:
        cap = int(getattr(pltpu.get_tpu_info(), "vmem_capacity_bytes", 64 << 20))
    except Exception:
        cap = 64 << 20          # conservative (v7x has 64 MiB per TensorCore)
    return int(min(48 << 20, max(cap * 45 // 100, 8 << 20)))


# ----------------------- fused single-kernel fast path ----------------------
def _fused_kernel(x_ref, gamma_ref, beta_ref, wt_ref, bias_ref, o_ref, *, true_n):
    x = x_ref[...].astype(jnp.float32)                          # (n_f, cin)
    shift = x[0:1, :]                                           # cancellation guard
    rows = jax.lax.broadcasted_iota(jnp.int32, (x.shape[0], 1), 0)
    d = jnp.where(rows < true_n, x - shift, 0.0)                # mask padded rows
    inv_n = jnp.float32(1.0 / true_n)
    m_d = jnp.sum(d, axis=0, keepdims=True) * inv_n             # shifted mean
    var = jnp.maximum(jnp.sum(d * d, axis=0, keepdims=True) * inv_n - m_d * m_d, 0.0)
    a = gamma_ref[...] * jax.lax.rsqrt(var + jnp.float32(_BN_EPS))
    b = beta_ref[...] - (m_d + shift) * a
    y = x * a + b
    g = 0.5 * y * (1.0 + jax.lax.erf(y * jnp.float32(_INV_SQRT2)))
    out = jnp.dot(g.astype(jnp.bfloat16), wt_ref[...],
                  preferred_element_type=jnp.float32)
    o_ref[...] = (out + bias_ref[...]).astype(o_ref.dtype)


# ------------------ Pass 1: per-feature (shifted) batch stats ---------------
def _stats_kernel(x_ref, shift_ref, sum_ref, sumsq_ref, *, tile_n, true_n,
                  tiles_per_split):
    c = pl.program_id(0)
    i = pl.program_id(1)

    @pl.when(i == 0)
    def _():
        sum_ref[...] = jnp.zeros_like(sum_ref)
        sumsq_ref[...] = jnp.zeros_like(sumsq_ref)

    x = x_ref[...].astype(jnp.float32)                          # (tile_n, cin)
    d = x - shift_ref[...]
    row0 = (c * tiles_per_split + i) * tile_n
    rows = row0 + jax.lax.broadcasted_iota(jnp.int32, (tile_n, 1), 0)
    d = jnp.where(rows < true_n, d, 0.0)                        # mask padded rows
    sum_ref[...] += jnp.sum(d, axis=0, keepdims=True)[None]     # (1, 1, cin)
    sumsq_ref[...] += jnp.sum(d * d, axis=0, keepdims=True)[None]


# --------------- Pass 2: scale/shift + GELU + Linear (MXU) ------------------
def _apply_kernel(x_ref, a_ref, b_ref, wt_ref, bias_ref, o_ref):
    x = x_ref[...].astype(jnp.float32)                          # (tile_n, cin)
    y = x * a_ref[...] + b_ref[...]                             # folded BatchNorm
    g = 0.5 * y * (1.0 + jax.lax.erf(y * jnp.float32(_INV_SQRT2)))   # exact-erf GELU
    out = jnp.dot(g.astype(jnp.bfloat16), wt_ref[...],
                  preferred_element_type=jnp.float32)
    o_ref[...] = (out + bias_ref[...]).astype(o_ref.dtype)      # (tile_n, tile_cout)


def comp_layer(x, gamma, beta, weight, bias, *, force_tiled=False):
    """x: (N, cin); gamma/beta: (cin,); weight: (cout, cin); bias: (cout,)."""
    n, cin = x.shape
    cout = weight.shape[0]
    out_dtype = x.dtype
    x_bytes = x.dtype.itemsize
    o_bytes = jnp.dtype(out_dtype).itemsize

    cout_p = _round_up(cout, 128)
    budget = _vmem_budget()

    # Parameter prep (tiny, O(cin*cout)): cin is left unpadded everywhere.
    gamma_r = jnp.asarray(gamma, jnp.float32).reshape(1, cin)
    beta_r = jnp.asarray(beta, jnp.float32).reshape(1, cin)
    wt_p = jnp.pad(jnp.asarray(weight, jnp.float32).T,
                   ((0, 0), (0, cout_p - cout))).astype(jnp.bfloat16)  # (cin, cout_p)
    bias_p = jnp.pad(jnp.asarray(bias, jnp.float32),
                     (0, cout_p - cout)).reshape(1, cout_p)

    # ---------------- fused single-kernel fast path --------------------------
    n_f = _round_up(n, 8)
    fused_bytes = (n_f * cin * x_bytes + n_f * cout_p * o_bytes
                   + cin * cout_p * 2
                   + 2 * n_f * (cin + cout_p) * 4        # f32 temporaries
                   + (1 << 20))
    if not force_tiled and fused_bytes <= int(budget * 0.6):
        x_f = jnp.pad(x, ((0, n_f - n), (0, 0)))
        out_p = pl.pallas_call(
            functools.partial(_fused_kernel, true_n=n),
            out_shape=jax.ShapeDtypeStruct((n_f, cout_p), out_dtype),
            compiler_params=pltpu.CompilerParams(vmem_limit_bytes=budget),
        )(x_f, gamma_r, beta_r, wt_p, bias_p)
        return out_p[:n, :cout]

    # ---------------- two-pass tiled path -------------------------------------
    # cout tiling: keep the whole bf16 weight resident when it fits the budget.
    w_budget = max(budget // 3, 4 << 20)
    if cin * cout_p * 2 <= w_budget:
        tile_cout = cout_p
    else:
        tile_cout = max(256, (w_budget // (4 * cin)) // 256 * 256)
        tile_cout = min(tile_cout, cout_p)
        cout_p = _round_up(cout_p, tile_cout)
        wt_p = jnp.pad(wt_p, ((0, 0), (0, cout_p - wt_p.shape[1])))
        bias_p = jnp.pad(bias_p, ((0, 0), (0, cout_p - bias_p.shape[1])))
    cout_tiles = cout_p // tile_cout
    w_resident = cin * tile_cout * 2 * (1 if cout_tiles == 1 else 2)

    # Adaptive tile_n against the VMEM budget (double-buffered x/out tiles,
    # resident weight, f32 temporaries).
    per_row = (2 * cin * x_bytes + 2 * tile_cout * o_bytes
               + 3 * cin * 4 + tile_cout * 4)
    avail = max(budget - w_resident - (2 << 20), 1 << 20)
    cap = max(avail // per_row, 8)
    tile_n = min(1024, cap, _round_up(n, 8))
    tile_n = (tile_n // 256 * 256) if tile_n >= 256 else max(8, tile_n // 8 * 8)

    n_p = _round_up(n, tile_n)
    n_tiles = n_p // tile_n
    # Split the pass-1 reduction 2 ways (v7x megacore); harmless on v5e/v6e.
    n_split = 2 if (n_tiles >= 2 and n_tiles % 2 == 0) else 1
    tiles_per_split = n_tiles // n_split

    x_p = jnp.pad(x, ((0, n_p - n), (0, 0)))        # native dtype, cin unpadded
    shift = x[0:1, :].astype(jnp.float32)           # per-feature shift (row 0)

    # ---- Pass 1: global shifted sum / sum-of-squares over the batch. ----
    vmem1 = int(min(budget, 4 * tile_n * cin * x_bytes + 2 * tile_n * cin * 4 + (2 << 20)))
    vmem1 = max(vmem1, 4 << 20)
    s_part, ss_part = pl.pallas_call(
        functools.partial(_stats_kernel, tile_n=tile_n, true_n=n,
                          tiles_per_split=tiles_per_split),
        out_shape=(jax.ShapeDtypeStruct((n_split, 1, cin), jnp.float32),
                   jax.ShapeDtypeStruct((n_split, 1, cin), jnp.float32)),
        grid_spec=pltpu.PrefetchScalarGridSpec(
            num_scalar_prefetch=0,
            grid=(n_split, tiles_per_split),
            in_specs=[
                pl.BlockSpec((tile_n, cin),
                             lambda c, i: (c * tiles_per_split + i, 0)),
                pl.BlockSpec((1, cin), lambda c, i: (0, 0)),
            ],
            out_specs=(pl.BlockSpec((1, 1, cin), lambda c, i: (c, 0, 0)),
                       pl.BlockSpec((1, 1, cin), lambda c, i: (c, 0, 0)))),
        compiler_params=pltpu.CompilerParams(
            dimension_semantics=("parallel", "arbitrary"),
            vmem_limit_bytes=vmem1),
    )(x_p, shift)

    # Tiny XLA epilogue: combine partials, fold BN into per-feature scale/shift.
    s = jnp.sum(s_part, axis=0)                     # (1, cin)
    ss = jnp.sum(ss_part, axis=0)                   # (1, cin)
    inv_n = jnp.float32(1.0 / n)                    # true batch size
    mean_d = s * inv_n
    var = jnp.maximum(ss * inv_n - mean_d * mean_d, 0.0)   # biased variance
    a = gamma_r * jax.lax.rsqrt(var + jnp.float32(_BN_EPS))
    b = beta_r - (mean_d + shift) * a

    # ---- Pass 2: y = x*a + b -> GELU -> bf16 matmul + bias. ----
    vmem2 = int(min(budget,
                    2 * tile_n * cin * x_bytes + 2 * tile_n * tile_cout * o_bytes
                    + w_resident + tile_n * (cin + tile_cout) * 4 + (2 << 20)))
    vmem2 = max(vmem2, 4 << 20)
    w_read_bytes = cin * cout_p * 2 * (n_tiles if cout_tiles > 1 else 1)
    cost = pl.CostEstimate(
        flops=2 * n_p * cin * cout_p,
        transcendentals=n_p * cin,
        bytes_accessed=n_p * cin * x_bytes + n_p * cout_p * o_bytes + w_read_bytes)

    def _run_pass2(use_single_buffer):
        def inv_spec(shape, index_map, invariant):
            if invariant and use_single_buffer:
                # Grid-invariant operand: no need to double-buffer it.
                return pl.BlockSpec(shape, index_map, pipeline_mode=pl.Buffered(1))
            return pl.BlockSpec(shape, index_map)

        w_invariant = (cout_tiles == 1)
        grid_spec = pltpu.PrefetchScalarGridSpec(
            num_scalar_prefetch=0,
            grid=(n_tiles, cout_tiles),
            in_specs=[
                pl.BlockSpec((tile_n, cin), lambda i, j: (i, 0)),
                inv_spec((1, cin), lambda i, j: (0, 0), True),
                inv_spec((1, cin), lambda i, j: (0, 0), True),
                inv_spec((cin, tile_cout), lambda i, j: (0, j), w_invariant),
                inv_spec((1, tile_cout), lambda i, j: (0, j), w_invariant),
            ],
            out_specs=pl.BlockSpec((tile_n, tile_cout), lambda i, j: (i, j)))
        return pl.pallas_call(
            _apply_kernel,
            out_shape=jax.ShapeDtypeStruct((n_p, cout_p), out_dtype),
            grid_spec=grid_spec,
            compiler_params=pltpu.CompilerParams(
                dimension_semantics=("parallel", "parallel"),
                vmem_limit_bytes=vmem2),
            cost_estimate=cost,
        )(x_p, a, b, wt_p, bias_p)

    try:
        out_p = _run_pass2(True)
    except Exception:
        # pl.Buffered(1) / pipeline_mode unsupported -> default double-buffering.
        out_p = _run_pass2(False)

    return out_p[:n, :cout]


def comp_layer_ref(x, gamma, beta, weight, bias):
    """Pure-JAX f32 reference mirroring PyTorch training-mode forward."""
    xf = x.astype(jnp.float32)
    mean = jnp.mean(xf, axis=0, keepdims=True)
    var = jnp.mean((xf - mean) ** 2, axis=0, keepdims=True)     # biased
    xhat = (xf - mean) / jnp.sqrt(var + _BN_EPS)
    y = xhat * gamma[None, :].astype(jnp.float32) + beta[None, :].astype(jnp.float32)
    g = 0.5 * y * (1.0 + jax.lax.erf(y * jnp.float32(_INV_SQRT2)))
    out = g @ weight.astype(jnp.float32).T + bias.astype(jnp.float32)[None, :]
    return out.astype(x.dtype)


if __name__ == "__main__":
    # Small shapes consistent with the module: batch=8, cin=32, cout=16.
    N, CIN, COUT = 8, 32, 16
    key = jax.random.PRNGKey(0)
    kx, kg, kb, kw, kbias = jax.random.split(key, 5)

    x = jax.random.normal(kx, (N, CIN), dtype=jnp.float32)
    gamma = 1.0 + 0.1 * jax.random.normal(kg, (CIN,), dtype=jnp.float32)
    beta = 0.1 * jax.random.normal(kb, (CIN,), dtype=jnp.float32)
    bound = 1.0 / jnp.sqrt(jnp.float32(CIN))
    weight = jax.random.uniform(kw, (COUT, CIN), minval=-bound, maxval=bound,
                                dtype=jnp.float32)
    bias = jax.random.uniform(kbias, (COUT,), minval=-bound, maxval=bound,
                              dtype=jnp.float32)

    out = jax.block_until_ready(comp_layer(x, gamma, beta, weight, bias))
    ref = comp_layer_ref(x, gamma, beta, weight, bias)
    assert out.shape == (N, COUT)
    # Tolerance reflects bf16 MXU operands (f32 accumulation) in the kernel.
    assert jnp.allclose(out, ref, atol=3e-2, rtol=3e-2), (
        float(jnp.max(jnp.abs(out - ref))))

    # Also exercise the two-pass tiled path (split pass-1 reduction, resident
    # single-buffered weight, adaptive tile_n) at a modest larger shape.
    N2, CIN2, COUT2 = 600, 96, 160
    k2 = jax.random.split(jax.random.PRNGKey(1), 5)
    x2 = jax.random.normal(k2[0], (N2, CIN2), dtype=jnp.float32)
    g2 = 1.0 + 0.1 * jax.random.normal(k2[1], (CIN2,), dtype=jnp.float32)
    b2 = 0.1 * jax.random.normal(k2[2], (CIN2,), dtype=jnp.float32)
    bound2 = 1.0 / jnp.sqrt(jnp.float32(CIN2))
    w2 = jax.random.uniform(k2[3], (COUT2, CIN2), minval=-bound2, maxval=bound2,
                            dtype=jnp.float32)
    bb2 = jax.random.uniform(k2[4], (COUT2,), minval=-bound2, maxval=bound2,
                             dtype=jnp.float32)

    out2 = jax.block_until_ready(
        comp_layer(x2, g2, b2, w2, bb2, force_tiled=True))
    ref2 = comp_layer_ref(x2, g2, b2, w2, bb2)
    assert out2.shape == (N2, COUT2)
    assert jnp.allclose(out2, ref2, atol=5e-2, rtol=5e-2), (
        float(jnp.max(jnp.abs(out2 - ref2))))

    print("KERNEL_OK")
</pallas_src>

<mosaic_0001>
module attributes {stable_mosaic.version = 11 : i64} {
  func.func @_fused_kernel(%arg0: memref<8x32xf32, #tpu.memory_space<vmem>>, %arg1: memref<1x32xf32, #tpu.memory_space<vmem>>, %arg2: memref<1x32xf32, #tpu.memory_space<vmem>>, %arg3: memref<32x128xbf16, #tpu.memory_space<vmem>>, %arg4: memref<1x128xf32, #tpu.memory_space<vmem>>, %arg5: memref<8x128xf32, #tpu.memory_space<vmem>>) attributes {dimension_semantics = [], scalar_prefetch = 0 : i64, scratch_operands = 0 : i64, tpu.core_type = #tpu.core_type<tc>} {
    %c0 = arith.constant 0 : index
    %c0_0 = arith.constant 0 : index
    %0 = vector.load %arg0[%c0, %c0_0] : memref<8x32xf32, #tpu.memory_space<vmem>>, vector<8x32xf32>
    %1 = vector.extract_strided_slice %0 {offsets = [0, 0], sizes = [1, 32], strides = [1, 1]} : vector<8x32xf32> to vector<1x32xf32>
    %2 = tpu.iota {dimensions = array<i32: 0>} : vector<8x1xi32>
    %c8_i32 = arith.constant 8 : i32
    %3 = vector.broadcast %c8_i32 : i32 to vector<8x1xi32>
    %4 = arith.cmpi slt, %2, %3 : vector<8x1xi32>
    %5 = vector.broadcast %1 : vector<1x32xf32> to vector<8x32xf32>
    %6 = arith.subf %0, %5 : vector<8x32xf32>
    %cst = arith.constant 0.000000e+00 : f32
    %7 = vector.shape_cast %4 : vector<8x1xi1> to vector<8x1xi1>
    %8 = vector.broadcast %7 : vector<8x1xi1> to vector<8x32xi1>
    %9 = vector.broadcast %cst : f32 to vector<8x32xf32>
    %10 = arith.select %8, %6, %9 : vector<8x32xi1>, vector<8x32xf32>
    %cst_1 = arith.constant dense<0.000000e+00> : vector<32xf32>
    %11 = vector.multi_reduction <add>, %10, %cst_1 [0] : vector<8x32xf32> to vector<32xf32>
    %12 = vector.shape_cast %11 : vector<32xf32> to vector<1x32xf32>
    %cst_2 = arith.constant 1.250000e-01 : f32
    %13 = vector.broadcast %cst_2 : f32 to vector<1x32xf32>
    %14 = arith.mulf %12, %13 : vector<1x32xf32>
    %15 = arith.mulf %10, %10 : vector<8x32xf32>
    %cst_3 = arith.constant dense<0.000000e+00> : vector<32xf32>
    %16 = vector.multi_reduction <add>, %15, %cst_3 [0] : vector<8x32xf32> to vector<32xf32>
    %17 = vector.shape_cast %16 : vector<32xf32> to vector<1x32xf32>
    %cst_4 = arith.constant 1.250000e-01 : f32
    %18 = vector.broadcast %cst_4 : f32 to vector<1x32xf32>
    %19 = arith.mulf %17, %18 : vector<1x32xf32>
    %20 = arith.mulf %14, %14 : vector<1x32xf32>
    %21 = arith.subf %19, %20 : vector<1x32xf32>
    %cst_5 = arith.constant 0.000000e+00 : f32
    %22 = vector.broadcast %cst_5 : f32 to vector<1x32xf32>
    %23 = arith.maximumf %21, %22 : vector<1x32xf32>
    %c0_6 = arith.constant 0 : index
    %c0_7 = arith.constant 0 : index
    %24 = vector.load %arg1[%c0_6, %c0_7] : memref<1x32xf32, #tpu.memory_space<vmem>>, vector<1x32xf32>
    %cst_8 = arith.constant 9.99999974E-6 : f32
    %25 = vector.broadcast %cst_8 : f32 to vector<1x32xf32>
    %26 = arith.addf %23, %25 : vector<1x32xf32>
    %27 = math.rsqrt %26 : vector<1x32xf32>
    %28 = arith.mulf %24, %27 : vector<1x32xf32>
    %c0_9 = arith.constant 0 : index
    %c0_10 = arith.constant 0 : index
    %29 = vector.load %arg2[%c0_9, %c0_10] : memref<1x32xf32, #tpu.memory_space<vmem>>, vector<1x32xf32>
    %30 = arith.addf %14, %1 : vector<1x32xf32>
    %31 = arith.mulf %30, %28 : vector<1x32xf32>
    %32 = arith.subf %29, %31 : vector<1x32xf32>
    %33 = vector.broadcast %28 : vector<1x32xf32> to vector<8x32xf32>
    %34 = arith.mulf %0, %33 : vector<8x32xf32>
    %35 = vector.broadcast %32 : vector<1x32xf32> to vector<8x32xf32>
    %36 = arith.addf %34, %35 : vector<8x32xf32>
    %cst_11 = arith.constant 5.000000e-01 : f32
    %37 = vector.broadcast %cst_11 : f32 to vector<8x32xf32>
    %38 = arith.mulf %37, %36 : vector<8x32xf32>
    %cst_12 = arith.constant 0.707106769 : f32
    %39 = vector.broadcast %cst_12 : f32 to vector<8x32xf32>
    %40 = arith.mulf %36, %39 : vector<8x32xf32>
    %41 = math.erf %40 : vector<8x32xf32>
    %cst_13 = arith.constant 1.000000e+00 : f32
    %42 = vector.broadcast %cst_13 : f32 to vector<8x32xf32>
    %43 = arith.addf %42, %41 : vector<8x32xf32>
    %44 = arith.mulf %38, %43 : vector<8x32xf32>
    %45 = arith.truncf %44 : vector<8x32xf32> to vector<8x32xbf16>
    %c0_14 = arith.constant 0 : index
    %c0_15 = arith.constant 0 : index
    %46 = vector.load %arg3[%c0_14, %c0_15] : memref<32x128xbf16, #tpu.memory_space<vmem>>, vector<32x128xbf16>
    %cst_16 = arith.constant dense<0.000000e+00> : vector<8x128xf32>
    %47 = tpu.matmul %45, %46, %cst_16 {dimension_numbers = #tpu.dot_dimension_numbers<[1], [0], [0], [1], [0, 0, 1, 1], [], []>} : vector<8x32xbf16>, vector<32x128xbf16>, vector<8x128xf32> -> vector<8x128xf32>
    %c0_17 = arith.constant 0 : index
    %c0_18 = arith.constant 0 : index
    %48 = vector.load %arg4[%c0_17, %c0_18] : memref<1x128xf32, #tpu.memory_space<vmem>>, vector<1x128xf32>
    %49 = vector.broadcast %48 : vector<1x128xf32> to vector<8x128xf32>
    %50 = arith.addf %47, %49 : vector<8x128xf32>
    %c0_19 = arith.constant 0 : index
    %c0_20 = arith.constant 0 : index
    %51 = vector.load %arg5[%c0_19, %c0_20] : memref<8x128xf32, #tpu.memory_space<vmem>>, vector<8x128xf32>
    tpu.vector_store %arg5[%c0_19, %c0_20], %50 {strides = array<i32>} : memref<8x128xf32, #tpu.memory_space<vmem>>, vector<8x128xf32>,
    return
  }
}

</mosaic_0001>

<bundles_post_ra>
// kernel: tpu_custom_call.1
= control target key start
LH: loop header
LB: loop body
LE: loop exit
PB: predicated region body
PF: predicated region fallthrough
CT: control target
= control target key end

     0   :  { %10 = vsyncpa [#allocation3], 0  ;;  %s402_s0 = inlined_call_operand.hbm [shape: f32[8,32], index: 0, kind: input, shape index: {}]   ;;  %s403_s1 = inlined_call_operand.hbm [shape: f32[1,32], index: 1, kind: input, shape index: {}]   ;;  %s404_s2 = inlined_call_operand.vmem [shape: f32[1,32], index: 2, kind: input, shape index: {}]   ;;  %s405_s3 = inlined_call_operand.hbm [shape: bf16[32,128], index: 3, kind: input, shape index: {}]   ;;  %s406_s4 = inlined_call_operand.vmem [shape: f32[1,128], index: 4, kind: input, shape index: {}]   ;;  %s407_s5 = inlined_call_operand.hbm [shape: f32[8,128], index: 5, kind: output, shape index: {}]  }
   0x1   :  { %11 = vsyncpa [#allocation6], 0  ;;  %s29_s20 = sshll.u32 %s403_s1, 4  ;;  %s30_s20 = int_to_ptr.hbm [resolvable:$true] %s29_s20 }
   0x2   :  { %12 = vsyncpa [#allocation4], 0  ;;  %s345_s21 = smov [#allocation5]   ;;  %s18_s25 = sshll.u32 %s402_s0, 4  ;;  %s19_s25 = int_to_ptr.hbm [resolvable:$true] %s18_s25 }
   0x3   :  { %s31_s22 = sshll.u32 %s345_s21, 4  ;;  %s346_s26 = smov [#allocation2]   ;;  %s32_s22 = int_to_ptr.vmem [resolvable:$true] %s31_s22 }
   0x4   :  { %34 = dma.hbm_to_vmem [thread:$0]  %s30_s20, 16, %s32_s22, [#allocation6]  }
   0x5   :  { %s20_s27 = sshll.u32 %s346_s26, 4  ;;  %s41_s30 = sshll.u32 %s405_s3, 4  ;;  %s21_s27 = int_to_ptr.vmem [resolvable:$true] %s20_s27  ;;  %s42_s30 = int_to_ptr.hbm [resolvable:$true] %s41_s30 }
   0x6   :  { %23 = dma.hbm_to_vmem [thread:$0]  %s19_s25, 128, %s21_s27, [#allocation3]  }
   0x7   :  { %s347_s1 = smov [#allocation7]   ;;  %s348_s7 = smov 64  }
   0x8   :  { %s43_s6 = sshll.u32 %s347_s1, 4  ;;  %s349_s8 = smov 4   ;;  %s44_s6 = int_to_ptr.vmem [resolvable:$true] %s43_s6 }
   0x9   :  { %49 = dma.hbm_to_vmem [thread:$0]  %s42_s30, 256, %s44_s6, [#allocation6], %s348_s7, %s348_s7, %s349_s8  }
   0xa   :  { %339 = dma.done.wait [#allocation3], 128  }
   0xb   :  { %340 = vsyncadd [#allocation3], 4294967168 }
   0xc   :  { %341 = dma.done.wait [#allocation6], 272  }
   0xd   :  { %342 = vsyncadd [#allocation6], 4294967024  ;;  %v231_v0 = vld [vmem:[#allocation7 + $0x8] sm:$0xff]  ;;  %v65_v1 = vld [vmem:[#allocation2] sm:$0xff]  ;;  %vm74_vm0 = vcmask 261120   ;;  %s350_s10 = smov [#allocation8]  }
   0xe   :  { %v69_v2 = vperm.slane %v65_v1, 0  ;;  %194 = vmatpush.bf16.msra.mxu0 %v231_v0  ;;  %v230_v3 = vld [vmem:[#allocation7] sm:$0xff]  ;;  %v95_v31 = vld [vmem:[#allocation5] sm:$0x1]  ;;  %v108_v36 = vld [vmem:[%s404_s2] sm:$0x1] }
   0xf   :  { %s207_s11 = sshll.u32 %s350_s10, 4  ;;  %s209_s14 = sshll.u32 %s407_s5, 4  ;;  %s208_s11 = int_to_ptr.vmem [resolvable:$true] %s207_s11  ;;  %s210_s14 = int_to_ptr.hbm [resolvable:$true] %s209_s14 }
  0x10   :  { %v70_v4 = vsub.f32 %v65_v1, %v69_v2 }
  0x12   :  { %v75_v5 = vsel %vm74_vm0, %v70_v4, 0.0  ;;  %v83_v6 = vmul.f32 %v70_v4, %v70_v4  ;;  %195 = vmatpush.bf16.msra.mxu0 %v230_v3 }
  0x13   :  { %v76_v7 = vrot.slane %v75_v5, 4 }
  0x14   :  { %v84_v8 = vsel %vm74_vm0, %v83_v6, 0.0 }
  0x15   :  { %v77_v9 = vadd.f32 %v76_v7, %v75_v5  ;;  %v85_v10 = vrot.slane %v84_v8, 4 }
  0x17   :  { %v78_v11 = vrot.slane %v77_v9, 2  ;;  %v86_v12 = vadd.f32 %v85_v10, %v84_v8 }
  0x19   :  { %v79_v13 = vadd.f32 %v78_v11, %v77_v9  ;;  %v87_v14 = vrot.slane %v86_v12, 2 }
  0x1b   :  { %v80_v15 = vrot.slane %v79_v13, 1  ;;  %v88_v16 = vadd.f32 %v87_v14, %v86_v12 }
  0x1d   :  { %v81_v17 = vadd.f32 %v80_v15, %v79_v13  ;;  %v89_v18 = vrot.slane %v88_v16, 1 }
  0x1f   :  { %v82_v19 = vmul.f32 0.125, %v81_v17  ;;  %v90_v20 = vadd.f32 %v89_v18, %v88_v16 }
  0x21   :  { %v91_v21 = vmul.f32 0.125, %v90_v20  ;;  %v92_v22 = vmul.f32 %v82_v19, %v82_v19  ;;  %v109_v33 = vadd.f32 %v82_v19, %v65_v1  ;;  %v238_v19 = vld [vmem:[%s406_s4] ss:$0 sm:$0xff] }
  0x23   :  { %v93_v23 = vsub.f32 %v91_v21, %v92_v22 }
  0x25   :  { %v94_v24 = vmax.f32 %v93_v23, 0.0 }
  0x27   :  { %v96_v25 = vadd.f32 1e-05, %v94_v24 }
  0x29   :  { %239 = vrsqrt.f32 %v96_v25  ;;  %vm103_vm1 = vweird.f32 %v96_v25 }
  0x2f   :  { %v240_v26 = vpop.eup %239 }
  0x30   :  { %v98_v27 = vmul.f32 %v240_v26, %v96_v25  ;;  %vm104_vm2 = vweird.f32 %v240_v26 }
  0x31   :  { %vm105_vm3 = vmor %vm103_vm1, %vm104_vm2 }
  0x32   :  { %v99_v28 = vmul.f32 %v240_v26, %v98_v27 }
  0x34   :  { %v100_v29 = vmul.f32 0.5, %v99_v28 }
  0x36   :  { %v101_v30 = vsub.f32 1.5, %v100_v29 }
  0x38   :  { %v102_v32 = vmul.f32 %v240_v26, %v101_v30 }
  0x3a   :  { %v106_v34 = vsel %vm105_vm3, %v240_v26, %v102_v32 }
  0x3b   :  { %v107_v35 = vmul.f32 %v106_v34, %v95_v31 }
  0x3d   :  { %v110_v37 = vmul.f32 %v109_v33, %v107_v35  ;;  %v113_v38 = vperm.slane %v107_v35, 0 }
  0x3f   :  { %v111_v39 = vsub.f32 %v108_v36, %v110_v37  ;;  %v115_v40 = vmul.f32 %v113_v38, %v65_v1 }
  0x41   :  { %v117_v41 = vperm.slane %v111_v39, 0 }
  0x43   :  { %v119_v42 = vadd.f32 %v117_v41, %v115_v40 }
  0x45   :  { %v121_v43 = vmul.f32 0.70710677, %v119_v42  ;;  %v120_v14 = vmul.f32 0.5, %v119_v42 }
  0x47   :  { %v122_v44 = vmul.f32 %v121_v43, %v121_v43 }
  0x49   :  { %v123_v45 = vmin.f32 %v122_v44, 16.0 }
  0x4b   :  { %v124_v46 = vmul.f32 2.1237322e-06, %v123_v45  ;;  %v135_v47 = vmul.f32 3.8918573e-05, %v123_v45 }
  0x4d   :  { %v125_v48 = vadd.f32 0.00028619796, %v124_v46  ;;  %v136_v49 = vadd.f32 0.001143296, %v135_v47 }
  0x4f   :  { %v126_v50 = vmul.f32 %v125_v48, %v123_v45  ;;  %v137_v51 = vmul.f32 %v136_v49, %v123_v45 }
  0x51   :  { %v127_v52 = vadd.f32 0.0036580483, %v126_v50  ;;  %v138_v53 = vadd.f32 0.014752088, %v137_v51 }
  0x53   :  { %v128_v54 = vmul.f32 %v127_v52, %v123_v45  ;;  %v139_v55 = vmul.f32 %v138_v53, %v123_v45 }
  0x55   :  { %v140_v56 = vadd.f32 0.112945676, %v139_v55  ;;  %v129_v57 = vadd.f32 0.05243302, %v128_v54 }
  0x57   :  { %v141_v58 = vmul.f32 %v140_v56, %v123_v45  ;;  %v130_v60 = vmul.f32 %v129_v57, %v123_v45 }
  0x59   :  { %v142_v59 = vadd.f32 0.4994258, %v141_v58  ;;  %v131_v63 = vadd.f32 0.18741608, %v130_v60 }
  0x5b   :  { %v143_v61 = vmul.f32 %v142_v59, %v123_v45  ;;  %v132_v0 = vmul.f32 %v131_v63, %v123_v45 }
  0x5d   :  { %v144_v62 = vadd.f32 1.0, %v143_v61  ;;  %v133_v3 = vadd.f32 1.1283791, %v132_v0 }
  0x5f   :  { %241 = vrcp.f32 %v144_v62  ;;  %v156_v4 = vand.u32 2147483648, %v144_v62  ;;  %vm150_vm4 = vweird.f32 %v144_v62  ;;  %v154_v6 = vand.u32 2147483647, %v144_v62 }
  0x60   :  { %v134_v9 = vmul.f32 %v133_v3, %v121_v43 }
  0x61   :  { %v157_v8 = vor.u32 1.1754944e-38, %v156_v4  ;;  %vm155_vm7 = vcmp.eq.f32.partialorder %v154_v6, 8.507059e+37 }
  0x65   :  { %v242_v1 = vpop.eup %241 }
  0x66   :  { %v146_v2 = vmul.f32 %v242_v1, %v144_v62  ;;  %vm151_vm5 = vweird.f32 %v242_v1 }
  0x67   :  { %vm152_vm6 = vmor %vm150_vm4, %vm151_vm5 }
  0x68   :  { %v147_v5 = vsub.f32 1.0, %v146_v2 }
  0x6a   :  { %v148_v7 = vmul.f32 %v242_v1, %v147_v5 }
  0x6c   :  { %v149_v10 = vadd.f32 %v242_v1, %v148_v7 }
  0x6e   :  { %v153_v11 = vsel %vm152_vm6, %v242_v1, %v149_v10 }
  0x6f   :  { %v158_v12 = vsel %vm155_vm7, %v157_v8, %v153_v11 }
  0x70   :  { %v159_v13 = vmul.f32 %v158_v12, %v134_v9 }
  0x72   :  { %v220_v15 = vclamps-f32 %v159_v13, 1.0 }
  0x74   :  { %v162_v16 = vadd.f32 1.0, %v220_v15 }
  0x76   :  { %v163_v17 = vmul.f32 %v162_v16, %v120_v14 }
  0x78   :  { %v164_v18 = vpack.c.bf16 %v163_v17, %v163_v17 }
  0x7a   :  { %229 = vmatmul.msk.bf16.vlgmr.msra.gmra.mxu0 %vm74_vm0, %v164_v18 }
  0xf7   :  { %v197_v20 = vpop.f32.mrf.mxu0 }
  0xf8   :  { %v198_v21 = vadd.f32 %v238_v19, %v197_v20 }
  0xfa   :  { %201 = vst [vmem:[#allocation8] sm:$0xff] %v198_v21 }
  0xfb   :  { %212 = dma.vmem_to_hbm [thread:$0]  %s208_s11, 128, %s210_s14, [#allocation4]  }
  0xff   :  { %v199_v22 = vpop.f32.mrf.mxu0 }
 0x100   :  { %343 = dma.done.wait [#allocation4], 128  }
 0x101   :  { %344 = vsyncadd [#allocation4], 4294967168 }
 0x102   :  { %217 = vsyncpa [#allocation3], 1 }
 0x103   :  { %218 = vsyncpa [#allocation6], 1 }
 0x104   :  { %219 = vsyncpa [#allocation4], 1 }

</bundles_post_ra>
